<compile_context>
chip_gen: v7x
topology: tpu7x:2x2x1
jax: 0.10.0
libtpu: 0.0.40
codegen_flags: <defaults>
</compile_context>

<pallas_src>
import math

import jax
import jax.numpy as jnp
from jax.experimental import pallas as pl
from jax.experimental.pallas import tpu as pltpu


def _cdiv(a: int, b: int) -> int:
    return -(-a // b)


def _round_up(a: int, b: int) -> int:
    return _cdiv(a, b) * b


def _scale_kernel(w_ref, x_ref, o_ref):
    # w_ref: SMEM (1, 1) f32 scalar weight; x_ref / o_ref: VMEM tiles.
    w = w_ref[0, 0]
    o_ref[...] = (x_ref[...] * w).astype(o_ref.dtype)


def linear_regression_forward(
    x: jax.Array,
    weights: jax.Array,
    *,
    lane_width: int = 1024,
    target_tile_bytes: int = 2 * 1024 * 1024,
) -> jax.Array:
    """y = weights * x  (weights has shape (1,), broadcast elementwise)."""
    assert weights.shape == (1,)

    orig_shape = x.shape
    n = int(math.prod(orig_shape)) if orig_shape else 1

    # ---- lane-dense slab layout -------------------------------------------
    lw = lane_width
    if n < lw:
        lw = 128  # avoid gross over-padding of tiny inputs; still lane-aligned
    padded_n = _round_up(n, lw)
    rows = padded_n // lw

    flat = x.reshape(-1)
    if padded_n != n:
        flat = jnp.pad(flat, (0, padded_n - n))
    x2d = flat.reshape(rows, lw)

    # ---- block sizing ------------------------------------------------------
    itemsize = jnp.dtype(x.dtype).itemsize
    # ~target_tile_bytes per x tile, multiple of 8 sublanes, at least 8 rows.
    br = max(8, (target_tile_bytes // (lw * itemsize)) // 8 * 8)
    if br >= rows:
        br = rows  # full-extent block (allowed even if not a multiple of 8)
        grid_rows = 1
    else:
        grid_rows = _cdiv(rows, br)
        # Rebalance so multi-block grids are reasonably even (v7x megacore).
        br = min(br, max(8, _round_up(_cdiv(rows, grid_rows), 8)))
        grid_rows = _cdiv(rows, br)

    out_dtype = jnp.result_type(x.dtype, weights.dtype)
    w2d = weights.reshape(1, 1).astype(jnp.float32)

    y2d = pl.pallas_call(
        _scale_kernel,
        out_shape=jax.ShapeDtypeStruct((rows, lw), out_dtype),
        grid_spec=pltpu.PrefetchScalarGridSpec(
            num_scalar_prefetch=0,
            grid=(grid_rows,),
            in_specs=[
                # Whole (1, 1) scalar weight, resident in SMEM.
                pl.BlockSpec(memory_space=pltpu.MemorySpace.SMEM),
                pl.BlockSpec((br, lw), lambda i: (i, 0)),
            ],
            out_specs=pl.BlockSpec((br, lw), lambda i: (i, 0)),
        ),
        compiler_params=pltpu.CompilerParams(
            dimension_semantics=("parallel",)),
    )(w2d, x2d)

    y = y2d.reshape(-1)
    if padded_n != n:
        y = y[:n]
    return y.reshape(orig_shape)


if __name__ == "__main__":
    key = jax.random.PRNGKey(0)
    k_w, k_x1, k_x2 = jax.random.split(key, 3)

    # Deterministic parameter init (mirrors nn.Parameter(torch.randn(1))).
    weights = jax.random.normal(k_w, (1,), dtype=jnp.float32)

    # --- test 1: default config, nd input, single lane-dense block ---------
    x1 = jax.random.normal(k_x1, (2, 4, 16, 16), dtype=jnp.float32)
    y1 = jax.block_until_ready(linear_regression_forward(x1, weights))
    ref1 = weights[0] * x1
    assert y1.shape == x1.shape
    assert jnp.allclose(y1, ref1, atol=1e-6, rtol=1e-6), "mismatch (test 1)"

    # --- test 2: ragged shape, forced multi-block grid + padded tail -------
    x2 = jax.random.normal(k_x2, (40, 130), dtype=jnp.float32)
    y2 = jax.block_until_ready(
        linear_regression_forward(
            x2, weights, lane_width=128, target_tile_bytes=8192))
    ref2 = weights[0] * x2
    assert y2.shape == x2.shape
    assert jnp.allclose(y2, ref2, atol=1e-6, rtol=1e-6), "mismatch (test 2)"

    print("KERNEL_OK")
</pallas_src>

<mosaic_0001>
module attributes {stable_mosaic.version = 11 : i64} {
  func.func @_scale_kernel(%arg0: i32, %arg1: memref<1x1xf32, #tpu.memory_space<smem>>, %arg2: memref<2x1024xf32, #tpu.memory_space<vmem>>, %arg3: memref<2x1024xf32, #tpu.memory_space<vmem>>) attributes {dimension_semantics = [#tpu.dimension_semantics<parallel>], iteration_bounds = array<i64: 1>, scalar_prefetch = 0 : i64, scratch_operands = 0 : i64, tpu.core_type = #tpu.core_type<tc>, window_params = [{transform_indices = @transform_0, window_bounds = array<i64: 1, 1>}, {transform_indices = @transform_1, window_bounds = array<i64: 2, 1024>}, {transform_indices = @transform_2, window_bounds = array<i64: 2, 1024>}]} {
    %c0 = arith.constant 0 : index
    %c0_0 = arith.constant 0 : index
    %0 = memref.load %arg1[%c0, %c0_0] : memref<1x1xf32, #tpu.memory_space<smem>>
    %c0_1 = arith.constant 0 : index
    %c0_2 = arith.constant 0 : index
    %1 = vector.load %arg2[%c0_1, %c0_2] : memref<2x1024xf32, #tpu.memory_space<vmem>>, vector<2x1024xf32>
    %2 = vector.broadcast %0 : f32 to vector<2x1024xf32>
    %3 = arith.mulf %1, %2 : vector<2x1024xf32>
    %c0_3 = arith.constant 0 : index
    %c0_4 = arith.constant 0 : index
    %4 = vector.load %arg3[%c0_3, %c0_4] : memref<2x1024xf32, #tpu.memory_space<vmem>>, vector<2x1024xf32>
    tpu.vector_store %arg3[%c0_3, %c0_4], %3 {strides = array<i32>} : memref<2x1024xf32, #tpu.memory_space<vmem>>, vector<2x1024xf32>,
    return
  }
  func.func @transform_0(%arg0: i32) -> (i32, i32) {
    %c0_i32 = arith.constant 0 : i32
    %c0_i32_0 = arith.constant 0 : i32
    %c0_i32_1 = arith.constant 0 : i32
    return %c0_i32, %c0_i32_0 : i32, i32
  }
  func.func @transform_1(%arg0: i32) -> (i32, i32) {
    %c0_i32 = arith.constant 0 : i32
    %c0_i32_0 = arith.constant 0 : i32
    return %arg0, %c0_i32 : i32, i32
  }
  func.func @transform_2(%arg0: i32) -> (i32, i32) {
    %c0_i32 = arith.constant 0 : i32
    %c0_i32_0 = arith.constant 0 : i32
    return %arg0, %c0_i32 : i32, i32
  }
}

</mosaic_0001>

<bundles_post_ra>
// kernel: tpu_custom_call.1
= control target key start
LH: loop header
LB: loop body
LE: loop exit
PB: predicated region body
PF: predicated region fallthrough
CT: control target
= control target key end

     0   :  { %8 = vsyncpa [#allocation4], 0  ;;  %s142_s0 = inlined_call_operand.<no memory space> [shape: f32[1,1], index: 0, kind: input, shape index: {}]   ;;  %s143_s1 = inlined_call_operand.hbm [shape: f32[2,1024], index: 1, kind: input, shape index: {}]   ;;  %s144_s2 = inlined_call_operand.hbm [shape: f32[2,1024], index: 2, kind: output, shape index: {}]  }
   0x1   :  { %9 = vsyncpa [#allocation5], 0  ;;  %s98_s9 = smov [#allocation3]   ;;  %s50_s13 = scalar_lea.hbm %s143_s1, 256 }
   0x2   :  { %s18_s10 = sshll.u32 %s98_s9, 4  ;;  %p51_p0 = scmp.ne.s32.totalorder %s143_s1, %s50_s13  ;;  %s19_s10 = int_to_ptr.vmem [resolvable:$true] %s18_s10 }
   0x3   :  { %p54_p1 = scmp.lt.u32.totalorder %s50_s13, %s143_s1 }
   0x5   :  { %p56_p2 = pnand %p54_p1, %p51_p0 }
   0x7   :  { %59 = shalt.err (!%p56_p2)
}
   0x8   :  { %s60_s18 = scalar_lea.vmem %s19_s10, 256  ;;  %p65_p4 = scmp.lt.s32.totalorder %s19_s10, %s19_s10 }
   0x9   :  { %p61_p3 = scmp.ne.s32.totalorder %s19_s10, %s60_s18  ;;  %p66_p5 = scmp.lt.s32.totalorder %s60_s18, %s60_s18 }
   0xb   :  { %p67_p6 = por %p66_p5, %p65_p4 }
   0xd   :  { %p68_p7 = pnand %p67_p6, %p61_p3 }
   0xf   :  { %71 = shalt.err (!%p68_p7)
}
  0x10   :  { %21 = dma.hbm_to_vmem [thread:$0]  %s143_s1, 256, %s19_s10, [#allocation4]  }
  0x11   :  { %94 = dma.done.wait [#allocation4], 256  }
  0x12   :  { %95 = vsyncadd [#allocation4], 4294967040  ;;  %v28_v0 = vstv %s142_s0  ;;  %s99_s23 = smov [#allocation6]   ;;  %v26_v1 = vld [vmem:[#allocation3] sm:$0xff]  ;;  %v27_v2 = vld [vmem:[#allocation3 + $0x8] sm:$0xff] }
  0x13   :  { %s39_s24 = sshll.u32 %s99_s23, 4  ;;  %v29_v3 = vmul.f32 %v28_v0, %v26_v1  ;;  %v30_v4 = vmul.f32 %v28_v0, %v27_v2  ;;  %s40_s24 = int_to_ptr.vmem [resolvable:$true] %s39_s24 }
  0x14   :  { %s72_s25 = scalar_lea.vmem %s40_s24, 256  ;;  %p77_p9 = scmp.lt.s32.totalorder %s40_s24, %s40_s24 }
  0x15   :  { %31 = vst [vmem:[#allocation6] sm:$0xff] %v29_v3  ;;  %32 = vst [vmem:[#allocation6 + $0x8] sm:$0xff] %v30_v4  ;;  %p73_p8 = scmp.ne.s32.totalorder %s40_s24, %s72_s25  ;;  %p78_p10 = scmp.lt.s32.totalorder %s72_s25, %s72_s25 }
  0x17   :  { %p79_p11 = por %p78_p10, %p77_p9 }
  0x19   :  { %p80_p12 = pnand %p79_p11, %p73_p8 }
  0x1b   :  { %83 = shalt.err (!%p80_p12)
}
  0x1c   :  { %s84_s0 = scalar_lea.hbm %s144_s2, 256 }
  0x1d   :  { %p85_p13 = scmp.ne.s32.totalorder %s144_s2, %s84_s0  ;;  %p88_p0 = scmp.lt.u32.totalorder %s84_s0, %s144_s2 }
  0x1f   :  { %p90_p1 = pnand %p88_p0, %p85_p13 }
  0x21   :  { %93 = shalt.err (!%p90_p1)
}
  0x22   :  { %42 = dma.vmem_to_hbm [thread:$0]  %s40_s24, 256, %s144_s2, [#allocation5]  }
  0x23   :  { %96 = dma.done.wait [#allocation5], 256  }
  0x24   :  { %97 = vsyncadd [#allocation5], 4294967040 }
  0x25   :  { %46 = vsyncpa [#allocation4], 1 }
  0x26   :  { %47 = vsyncpa [#allocation5], 1 }

</bundles_post_ra>
